<compile_context>
chip_gen: v7x
topology: tpu7x:2x2x1
jax: 0.10.0
libtpu: 0.0.40
codegen_flags: <defaults>
</compile_context>

<pallas_src>
import functools

import jax
import jax.numpy as jnp
from jax import lax
from jax.experimental import pallas as pl
from jax.experimental.pallas import tpu as pltpu


def _cdiv(a, b):
    return (a + b - 1) // b


def _round_up(a, b):
    return _cdiv(a, b) * b


# Per-input-array padded VMEM bytes per grid step (controls per-step DMA volume).
_BLOCK_TARGET = 4 * 1024 * 1024
# Per-chunk padded bytes processed at once inside the kernel (bounds transients).
_CHUNK_TARGET = 256 * 1024
# Max lane-tile width on the H*W axis (multiple of 128).
_TN_CAP = 2048


def _regloss_kernel(p_ref, t_ref, out_ref, acc_a_ref, acc_t_ref, *,
                    B, HW, TB, TN, CB, n0, ragged_b, ragged_hw):
    bi = pl.program_id(0)   # batch-tile index
    hi = pl.program_id(1)   # HW-tile index

    @pl.when((bi == 0) & (hi == 0))
    def _init():
        acc_a_ref[...] = jnp.zeros_like(acc_a_ref)
        acc_t_ref[...] = jnp.zeros_like(acc_t_ref)

    n_chunks = TB // CB  # static

    def process(j, carry):
        start = pl.multiple_of(jnp.int32(j) * CB, CB)
        # TODO(synk): PyTorch casts pred to float64; TPU Pallas has no f64, so the
        # hot path runs in float32 (vector-parallel accumulation keeps it accurate).
        p = p_ref[pl.ds(start, CB)].astype(jnp.float32)   # (CB, C, TN)
        t = t_ref[pl.ds(start, CB)].astype(jnp.float32)

        ch = lax.broadcasted_iota(jnp.int32, p.shape, 1)
        is0 = ch == 0

        # channel 0 :  sqrt(|(1-t0)*p0|) + sqrt(|t0*(p0-1)|)
        # channels>0:  sqrt(|t - p|)   (only rows 1..4 are kept at finalize)
        a1 = jnp.where(is0, (1.0 - t) * p, t - p)
        a2 = jnp.where(is0, t * (p - 1.0), 0.0)          # sqrt(0) == 0 elsewhere
        term = jnp.sqrt(jnp.abs(a1)) + jnp.sqrt(jnp.abs(a2))
        tacc = t                                         # ch-0 row extracted at finalize

        if ragged_b or ragged_hw:                        # trace-time: only if tails exist
            conds = []
            if ragged_b:
                row = lax.broadcasted_iota(jnp.int32, p.shape, 0)
                conds.append((bi * TB + start + row) < B)
            if ragged_hw:
                col = lax.broadcasted_iota(jnp.int32, p.shape, 2)
                conds.append((hi * TN + col) < HW)
            valid = conds[0] if len(conds) == 1 else (conds[0] & conds[1])
            term = jnp.where(valid, term, 0.0)
            tacc = jnp.where(valid, tacc, 0.0)

        # Fold over the chunk's leading (batch) axis: outermost dim => pure VALU
        # vreg adds, no cross-lane work.  Accumulators keep the (C, TN) structure.
        acc_a_ref[...] += term.sum(axis=0)
        acc_t_ref[...] += tacc.sum(axis=0)
        return carry

    if n_chunks == 1:
        process(0, 0)
    else:
        lax.fori_loop(0, n_chunks, process, 0, unroll=n_chunks <= 8)

    @pl.when((bi == pl.num_programs(0) - 1) & (hi == pl.num_programs(1) - 1))
    def _finalize():
        # Cross-lane reductions + scalar combine happen exactly once.
        ch = lax.broadcasted_iota(jnp.int32, acc_a_ref.shape, 0)
        a = acc_a_ref[...]
        s_l = jnp.sum(jnp.where(ch == 0, a, 0.0))                  # no_obj + is_obj sums
        s_reg = jnp.sum(jnp.where((ch >= 1) & (ch < 5), a, 0.0))   # reg term sum
        s_t0 = jnp.sum(jnp.where(ch == 0, acc_t_ref[...], 0.0))    # sum of target[:,0]
        inv_n = jnp.float32(1.0 / n0)                              # static denominator
        loss = s_l * inv_n + (s_t0 * inv_n) * s_reg
        out_ref[...] = jnp.zeros_like(out_ref) + loss


def reg_loss(pred, target):
    """pred, target: [B, C, H, W] with C >= 5. Returns a float32 scalar."""
    B, C, H, W = pred.shape
    assert C >= 5, "RegLoss needs at least 5 channels"
    HW = H * W
    n0 = B * HW
    if n0 == 0:
        return jnp.float32(float("nan"))   # torch: mean of empty tensor is NaN

    # Free reshape (merge contiguous trailing dims); no extra HBM pass.
    p = pred.reshape(B, C, HW)
    t = target.reshape(B, C, HW)

    if C > 16:
        # For very wide heads a single strided 5-channel copy beats streaming all
        # C channels through a bandwidth-bound kernel.
        p = p[:, :5, :]
        t = t[:, :5, :]
        C = 5

    C_pad = _round_up(C, 8)

    # Lane (HW) tiling: full extent when small (no tail masking needed, any HW is
    # legal as a full-dim block); 128-aligned tiles otherwise.
    TN = HW if HW <= _TN_CAP else _TN_CAP
    TN_pad = _round_up(TN, 128)
    n_hw = _cdiv(HW, TN)
    ragged_hw = (HW % TN) != 0

    # Batch tiling: size the per-step block for ~_BLOCK_TARGET padded VMEM bytes,
    # processed in CB-row chunks inside the kernel.
    bytes_per_row = C_pad * TN_pad * 4
    CB = max(1, min(B, _CHUNK_TARGET // bytes_per_row))
    TB = max(CB, min(B, _BLOCK_TARGET // bytes_per_row))
    TB = max(CB, (TB // CB) * CB)        # TB is a multiple of CB
    n_b = _cdiv(B, TB)
    ragged_b = (B % TB) != 0

    # VMEM budget: 2 inputs x 2 pipeline buffers + ~8 chunk-sized transients + accs.
    vmem_est = 4 * TB * bytes_per_row + 8 * CB * bytes_per_row \
               + 4 * C_pad * TN_pad * 4 + 8 * 128 * 4
    vmem_limit = int(min(max(2 * vmem_est, 32 << 20), 56 << 20))  # < v7x 64 MiB physical

    kernel = functools.partial(
        _regloss_kernel, B=B, HW=HW, TB=TB, TN=TN, CB=CB, n0=n0,
        ragged_b=ragged_b, ragged_hw=ragged_hw)

    in_map = lambda i, j: (i, 0, j)

    out = pl.pallas_call(
        kernel,
        out_shape=jax.ShapeDtypeStruct((8, 128), jnp.float32),
        grid_spec=pltpu.PrefetchScalarGridSpec(
            num_scalar_prefetch=0,
            grid=(n_b, n_hw),
            in_specs=[
                pl.BlockSpec((TB, C, TN), in_map),   # pred  (B, C, HW)
                pl.BlockSpec((TB, C, TN), in_map),   # target (B, C, HW)
            ],
            out_specs=pl.BlockSpec((8, 128), lambda i, j: (0, 0)),
            scratch_shapes=[
                pltpu.VMEM((C, TN), jnp.float32),    # ch0: no_obj+is_obj; ch1-4: reg
                pltpu.VMEM((C, TN), jnp.float32),    # ch0: sum of target[:,0]
            ],
        ),
        compiler_params=pltpu.CompilerParams(
            dimension_semantics=("arbitrary", "arbitrary"),
            vmem_limit_bytes=vmem_limit,
        ),
        cost_estimate=pl.CostEstimate(
            flops=16 * B * C * HW,
            transcendentals=2 * B * C * HW,
            bytes_accessed=2 * B * C * HW * pred.dtype.itemsize,
        ),
    )(p, t)

    return out[0, 0]


if __name__ == "__main__":
    key = jax.random.PRNGKey(0)
    k1, k2 = jax.random.split(key)

    B, C, H, W = 2, 5, 16, 16
    pred = jax.random.normal(k1, (B, C, H, W), dtype=jnp.float32)
    target = jax.random.uniform(k2, (B, C, H, W), dtype=jnp.float32)

    loss = jax.jit(reg_loss)(pred, target)
    jax.block_until_ready(loss)

    # Pure-JAX reference (f32) for a sanity check of the forward semantics.
    def ref_loss(pred, target):
        p0, t0 = pred[:, 0], target[:, 0]
        no_obj = jnp.sqrt(jnp.abs((1.0 - t0) * p0)).mean()
        is_obj = jnp.sqrt(jnp.abs(t0 * (p0 - 1.0))).mean()
        reg = t0.mean() * jnp.sqrt(jnp.abs(target[:, 1:5] - pred[:, 1:5])).sum()
        return no_obj + is_obj + reg

    expected = ref_loss(pred, target)
    assert jnp.allclose(loss, expected, rtol=1e-3, atol=1e-5), (loss, expected)
    print("KERNEL_OK")
</pallas_src>

<mosaic_0001>
module attributes {stable_mosaic.version = 11 : i64} {
  func.func @_regloss_kernel(%arg0: i32, %arg1: i32, %arg2: memref<2x5x256xf32, #tpu.memory_space<vmem>>, %arg3: memref<2x5x256xf32, #tpu.memory_space<vmem>>, %arg4: memref<8x128xf32, #tpu.memory_space<vmem>>, %arg5: memref<5x256xf32, #tpu.memory_space<vmem>>, %arg6: memref<5x256xf32, #tpu.memory_space<vmem>>) attributes {dimension_semantics = [#tpu.dimension_semantics<arbitrary>, #tpu.dimension_semantics<arbitrary>], iteration_bounds = array<i64: 1, 1>, scalar_prefetch = 0 : i64, scratch_operands = 2 : i64, tpu.core_type = #tpu.core_type<tc>, window_params = [{transform_indices = @transform_0, window_bounds = array<i64: 2, 5, 256>}, {transform_indices = @transform_1, window_bounds = array<i64: 2, 5, 256>}, {pipeline_mode = #tpu.pipeline_mode<synchronous>, transform_indices = @transform_2, window_bounds = array<i64: 8, 128>}]} {
    %c0_i32 = arith.constant 0 : i32
    %0 = arith.cmpi eq, %arg0, %c0_i32 : i32
    %c0_i32_0 = arith.constant 0 : i32
    %1 = arith.cmpi eq, %arg1, %c0_i32_0 : i32
    %2 = arith.andi %0, %1 : i1
    %3 = arith.extui %2 : i1 to i32
    %c0_i32_1 = arith.constant 0 : i32
    %4 = arith.cmpi ne, %3, %c0_i32_1 : i32
    scf.if %4 {
      %cst_22 = arith.constant 0.000000e+00 : f32
      %42 = vector.broadcast %cst_22 : f32 to vector<5x256xf32>
      %c0_23 = arith.constant 0 : index
      %c0_24 = arith.constant 0 : index
      %43 = vector.load %arg5[%c0_23, %c0_24] : memref<5x256xf32, #tpu.memory_space<vmem>>, vector<5x256xf32>
      tpu.vector_store %arg5[%c0_23, %c0_24], %42 {strides = array<i32>} : memref<5x256xf32, #tpu.memory_space<vmem>>, vector<5x256xf32>,
      %cst_25 = arith.constant 0.000000e+00 : f32
      %44 = vector.broadcast %cst_25 : f32 to vector<5x256xf32>
      %c0_26 = arith.constant 0 : index
      %c0_27 = arith.constant 0 : index
      %45 = vector.load %arg6[%c0_26, %c0_27] : memref<5x256xf32, #tpu.memory_space<vmem>>, vector<5x256xf32>
      tpu.vector_store %arg6[%c0_26, %c0_27], %44 {strides = array<i32>} : memref<5x256xf32, #tpu.memory_space<vmem>>, vector<5x256xf32>,
    } else {
    }
    %c0_i32_2 = arith.constant 0 : i32
    %c2_i32 = arith.constant 2 : i32
    %5 = arith.muli %c0_i32_2, %c2_i32 : i32
    %6 = tpu.assume_multiple %5, 2 : i32
    %7 = arith.index_cast %6 : i32 to index
    %c0 = arith.constant 0 : index
    %c0_3 = arith.constant 0 : index
    %8 = vector.load %arg2[%7, %c0, %c0_3] : memref<2x5x256xf32, #tpu.memory_space<vmem>>, vector<2x5x256xf32>
    %9 = arith.index_cast %6 : i32 to index
    %c0_4 = arith.constant 0 : index
    %c0_5 = arith.constant 0 : index
    %10 = vector.load %arg3[%9, %c0_4, %c0_5] : memref<2x5x256xf32, #tpu.memory_space<vmem>>, vector<2x5x256xf32>
    %11 = tpu.iota {dimensions = array<i32: 1>} : vector<2x5x256xi32>
    %c0_i32_6 = arith.constant 0 : i32
    %12 = vector.broadcast %c0_i32_6 : i32 to vector<2x5x256xi32>
    %13 = arith.cmpi eq, %11, %12 : vector<2x5x256xi32>
    %cst = arith.constant 1.000000e+00 : f32
    %14 = vector.broadcast %cst : f32 to vector<2x5x256xf32>
    %15 = arith.subf %14, %10 : vector<2x5x256xf32>
    %16 = arith.mulf %15, %8 : vector<2x5x256xf32>
    %17 = arith.subf %10, %8 : vector<2x5x256xf32>
    %18 = arith.select %13, %16, %17 : vector<2x5x256xi1>, vector<2x5x256xf32>
    %cst_7 = arith.constant 1.000000e+00 : f32
    %19 = vector.broadcast %cst_7 : f32 to vector<2x5x256xf32>
    %20 = arith.subf %8, %19 : vector<2x5x256xf32>
    %21 = arith.mulf %10, %20 : vector<2x5x256xf32>
    %cst_8 = arith.constant 0.000000e+00 : f32
    %22 = vector.broadcast %cst_8 : f32 to vector<2x5x256xf32>
    %23 = arith.select %13, %21, %22 : vector<2x5x256xi1>, vector<2x5x256xf32>
    %24 = math.absf %18 : vector<2x5x256xf32>
    %25 = math.sqrt %24 : vector<2x5x256xf32>
    %26 = math.absf %23 : vector<2x5x256xf32>
    %27 = math.sqrt %26 : vector<2x5x256xf32>
    %28 = arith.addf %25, %27 : vector<2x5x256xf32>
    %c0_9 = arith.constant 0 : index
    %c0_10 = arith.constant 0 : index
    %29 = vector.load %arg5[%c0_9, %c0_10] : memref<5x256xf32, #tpu.memory_space<vmem>>, vector<5x256xf32>
    %cst_11 = arith.constant dense<0.000000e+00> : vector<5x256xf32>
    %30 = vector.multi_reduction <add>, %28, %cst_11 [0] : vector<2x5x256xf32> to vector<5x256xf32>
    %31 = arith.addf %29, %30 : vector<5x256xf32>
    %c0_12 = arith.constant 0 : index
    %c0_13 = arith.constant 0 : index
    %32 = vector.load %arg5[%c0_12, %c0_13] : memref<5x256xf32, #tpu.memory_space<vmem>>, vector<5x256xf32>
    tpu.vector_store %arg5[%c0_12, %c0_13], %31 {strides = array<i32>} : memref<5x256xf32, #tpu.memory_space<vmem>>, vector<5x256xf32>,
    %c0_14 = arith.constant 0 : index
    %c0_15 = arith.constant 0 : index
    %33 = vector.load %arg6[%c0_14, %c0_15] : memref<5x256xf32, #tpu.memory_space<vmem>>, vector<5x256xf32>
    %cst_16 = arith.constant dense<0.000000e+00> : vector<5x256xf32>
    %34 = vector.multi_reduction <add>, %10, %cst_16 [0] : vector<2x5x256xf32> to vector<5x256xf32>
    %35 = arith.addf %33, %34 : vector<5x256xf32>
    %c0_17 = arith.constant 0 : index
    %c0_18 = arith.constant 0 : index
    %36 = vector.load %arg6[%c0_17, %c0_18] : memref<5x256xf32, #tpu.memory_space<vmem>>, vector<5x256xf32>
    tpu.vector_store %arg6[%c0_17, %c0_18], %35 {strides = array<i32>} : memref<5x256xf32, #tpu.memory_space<vmem>>, vector<5x256xf32>,
    %c0_i32_19 = arith.constant 0 : i32
    %37 = arith.cmpi eq, %arg0, %c0_i32_19 : i32
    %c0_i32_20 = arith.constant 0 : i32
    %38 = arith.cmpi eq, %arg1, %c0_i32_20 : i32
    %39 = arith.andi %37, %38 : i1
    %40 = arith.extui %39 : i1 to i32
    %c0_i32_21 = arith.constant 0 : i32
    %41 = arith.cmpi ne, %40, %c0_i32_21 : i32
    scf.if %41 {
      %42 = tpu.iota {dimensions = array<i32: 0>} : vector<5x256xi32>
      %c0_22 = arith.constant 0 : index
      %c0_23 = arith.constant 0 : index
      %43 = vector.load %arg5[%c0_22, %c0_23] : memref<5x256xf32, #tpu.memory_space<vmem>>, vector<5x256xf32>
      %c0_i32_24 = arith.constant 0 : i32
      %44 = vector.broadcast %c0_i32_24 : i32 to vector<5x256xi32>
      %45 = arith.cmpi eq, %42, %44 : vector<5x256xi32>
      %cst_25 = arith.constant 0.000000e+00 : f32
      %46 = vector.broadcast %cst_25 : f32 to vector<5x256xf32>
      %47 = arith.select %45, %43, %46 : vector<5x256xi1>, vector<5x256xf32>
      %48 = vector.shape_cast %47 : vector<5x256xf32> to vector<1x5x256xf32>
      %cst_26 = arith.constant dense<0.000000e+00> : vector<1xf32>
      %49 = vector.multi_reduction <add>, %48, %cst_26 [1, 2] : vector<1x5x256xf32> to vector<1xf32>
      %50 = vector.shape_cast %49 : vector<1xf32> to vector<1x1x1xf32>
      %51 = vector.extract %50[0, 0, 0] : f32 from vector<1x1x1xf32>
      %c1_i32 = arith.constant 1 : i32
      %52 = vector.broadcast %c1_i32 : i32 to vector<5x256xi32>
      %53 = arith.cmpi sge, %42, %52 : vector<5x256xi32>
      %c5_i32 = arith.constant 5 : i32
      %54 = vector.broadcast %c5_i32 : i32 to vector<5x256xi32>
      %55 = arith.cmpi slt, %42, %54 : vector<5x256xi32>
      %56 = arith.andi %53, %55 : vector<5x256xi1>
      %cst_27 = arith.constant 0.000000e+00 : f32
      %57 = vector.broadcast %cst_27 : f32 to vector<5x256xf32>
      %58 = arith.select %56, %43, %57 : vector<5x256xi1>, vector<5x256xf32>
      %59 = vector.shape_cast %58 : vector<5x256xf32> to vector<1x5x256xf32>
      %cst_28 = arith.constant dense<0.000000e+00> : vector<1xf32>
      %60 = vector.multi_reduction <add>, %59, %cst_28 [1, 2] : vector<1x5x256xf32> to vector<1xf32>
      %61 = vector.shape_cast %60 : vector<1xf32> to vector<1x1x1xf32>
      %62 = vector.extract %61[0, 0, 0] : f32 from vector<1x1x1xf32>
      %c0_i32_29 = arith.constant 0 : i32
      %63 = vector.broadcast %c0_i32_29 : i32 to vector<5x256xi32>
      %64 = arith.cmpi eq, %42, %63 : vector<5x256xi32>
      %c0_30 = arith.constant 0 : index
      %c0_31 = arith.constant 0 : index
      %65 = vector.load %arg6[%c0_30, %c0_31] : memref<5x256xf32, #tpu.memory_space<vmem>>, vector<5x256xf32>
      %cst_32 = arith.constant 0.000000e+00 : f32
      %66 = vector.broadcast %cst_32 : f32 to vector<5x256xf32>
      %67 = arith.select %64, %65, %66 : vector<5x256xi1>, vector<5x256xf32>
      %68 = vector.shape_cast %67 : vector<5x256xf32> to vector<1x5x256xf32>
      %cst_33 = arith.constant dense<0.000000e+00> : vector<1xf32>
      %69 = vector.multi_reduction <add>, %68, %cst_33 [1, 2] : vector<1x5x256xf32> to vector<1xf32>
      %70 = vector.shape_cast %69 : vector<1xf32> to vector<1x1x1xf32>
      %71 = vector.extract %70[0, 0, 0] : f32 from vector<1x1x1xf32>
      %cst_34 = arith.constant 0.001953125 : f32
      %72 = arith.mulf %51, %cst_34 : f32
      %cst_35 = arith.constant 0.001953125 : f32
      %73 = arith.mulf %71, %cst_35 : f32
      %74 = arith.mulf %73, %62 : f32
      %75 = arith.addf %72, %74 : f32
      %cst_36 = arith.constant 0.000000e+00 : f32
      %76 = vector.broadcast %cst_36 : f32 to vector<8x128xf32>
      %77 = vector.broadcast %75 : f32 to vector<8x128xf32>
      %78 = arith.addf %76, %77 : vector<8x128xf32>
      %c0_37 = arith.constant 0 : index
      %c0_38 = arith.constant 0 : index
      %79 = vector.load %arg4[%c0_37, %c0_38] : memref<8x128xf32, #tpu.memory_space<vmem>>, vector<8x128xf32>
      tpu.vector_store %arg4[%c0_37, %c0_38], %78 {strides = array<i32>} : memref<8x128xf32, #tpu.memory_space<vmem>>, vector<8x128xf32>,
    } else {
    }
    return
  }
  func.func @transform_0(%arg0: i32, %arg1: i32) -> (i32, i32, i32) {
    %c0_i32 = arith.constant 0 : i32
    %c0_i32_0 = arith.constant 0 : i32
    return %arg0, %c0_i32, %arg1 : i32, i32, i32
  }
  func.func @transform_1(%arg0: i32, %arg1: i32) -> (i32, i32, i32) {
    %c0_i32 = arith.constant 0 : i32
    %c0_i32_0 = arith.constant 0 : i32
    return %arg0, %c0_i32, %arg1 : i32, i32, i32
  }
  func.func @transform_2(%arg0: i32, %arg1: i32) -> (i32, i32) {
    %c0_i32 = arith.constant 0 : i32
    %c0_i32_0 = arith.constant 0 : i32
    %c0_i32_1 = arith.constant 0 : i32
    return %c0_i32, %c0_i32_0 : i32, i32
  }
}

</mosaic_0001>

<bundles_post_ra>
// kernel: reg_loss.1
= control target key start
LH: loop header
LB: loop body
LE: loop exit
PB: predicated region body
PF: predicated region fallthrough
CT: control target
= control target key end

     0   :  { %v34_v0 = vlaneseq  ;;  %vm135_vm0 = vcmask 1044480   ;;  %v247_v1 = vmov 0.0   ;;  %s427_s1 = inlined_call_operand.vmem [shape: f32[2,5,256], index: 1, kind: input, shape index: {}]   ;;  %s428_s0 = inlined_call_operand.vmem [shape: f32[2,5,256], index: 0, kind: input, shape index: {}]   ;;  %s429_s2 = inlined_call_operand.vmem [shape: f32[8,128], index: 2, kind: output, shape index: {}]  }
   0x1   :  { %19 = vst [vmem:[#allocation3] sm:$0x1f] %v247_v1  ;;  %20 = vst [vmem:[#allocation3 + $0x8] sm:$0x1f] %v247_v1  ;;  %v30_v2 = vld [vmem:[%s427_s1] sm:$0x1f] }
   0x2   :  { %v31_v3 = vld [vmem:[%s427_s1 + $0x8] sm:$0x1f]  ;;  %v32_v4 = vld [vmem:[%s427_s1 + $0x10] sm:$0x1f]  ;;  %17 = vst [vmem:[#allocation2] sm:$0x1f] %v247_v1 }
   0x3   :  { %18 = vst [vmem:[#allocation2 + $0x8] sm:$0x1f] %v247_v1  ;;  %v33_v5 = vld [vmem:[%s427_s1 + $0x18] sm:$0x1f]  ;;  %v275_v6 = vshrl.u32 %v34_v0, 7  ;;  %v38_v7 = vsub.f32 1.0, %v31_v3 }
   0x4   :  { %v39_v8 = vsub.f32 1.0, %v32_v4  ;;  %v148_v9 = vsel %vm135_vm0, %v30_v2, 0.0  ;;  %v40_v10 = vsub.f32 1.0, %v33_v5  ;;  %v149_v11 = vsel %vm135_vm0, %v32_v4, 0.0  ;;  %v24_v14 = vld [vmem:[%s428_s0] sm:$0x1f] }
   0x5   :  { %v151_v12 = vsel %vm135_vm0, %v31_v3, 0.0  ;;  %v152_v13 = vsel %vm135_vm0, %v33_v5, 0.0  ;;  %vm36_vm1 = vcmp.eq.s32.totalorder %v275_v6, 0  ;;  %v150_v15 = vadd.f32 %v149_v11, %v148_v9  ;;  %v25_v17 = vld [vmem:[%s428_s0 + $0x8] sm:$0x1f] }
   0x6   :  { %v153_v16 = vadd.f32 %v152_v13, %v151_v12  ;;  %v26_v18 = vld [vmem:[%s428_s0 + $0x10] sm:$0x1f]  ;;  %v37_v19 = vsub.f32 1.0, %v30_v2  ;;  %v27_v20 = vld [vmem:[%s428_s0 + $0x18] sm:$0x1f]  ;;  %v42_v21 = vmul.f32 %v38_v7, %v25_v17  ;;  %v45_v23 = vsub.f32 %v30_v2, %v24_v14 }
   0x7   :  { %v43_v22 = vmul.f32 %v39_v8, %v26_v18  ;;  %v46_v24 = vsub.f32 %v31_v3, %v25_v17  ;;  %v44_v26 = vmul.f32 %v40_v10, %v27_v20  ;;  %v47_v27 = vsub.f32 %v32_v4, %v26_v18 }
   0x8   :  { %v41_v25 = vmul.f32 %v37_v19, %v24_v14  ;;  %v48_v28 = vsub.f32 %v33_v5, %v27_v20  ;;  %v220_v30 = vadd.f32 -1.0, %v24_v14  ;;  %v221_v31 = vadd.f32 -1.0, %v25_v17  ;;  %v146_v33 = vld [vmem:[#allocation3] sm:$0x1f]  ;;  %v147_v34 = vld [vmem:[#allocation3 + $0x8] sm:$0x1f] }
   0x9   :  { %v50_v29 = vsel %vm36_vm1, %v42_v21, %v46_v24  ;;  %v222_v32 = vadd.f32 -1.0, %v26_v18  ;;  %v51_v36 = vsel %vm36_vm1, %v43_v22, %v47_v27  ;;  %v223_v38 = vadd.f32 -1.0, %v27_v20 }
   0xa   :  { %v49_v35 = vsel %vm36_vm1, %v41_v25, %v45_v23  ;;  %v52_v37 = vsel %vm36_vm1, %v44_v26, %v48_v28  ;;  %v154_v39 = vadd.f32 %v150_v15, %v146_v33  ;;  %v155_v40 = vadd.f32 %v153_v16, %v147_v34 }
   0xb   :  { %v57_v41 = vmul.f32 %v220_v30, %v30_v2  ;;  %v58_v42 = vmul.f32 %v221_v31, %v31_v3  ;;  %v59_v43 = vmul.f32 %v222_v32, %v32_v4  ;;  %v302_v44 = vand.u32 2147483647, %v49_v35 }
   0xc   :  { %v304_v45 = vand.u32 2147483647, %v50_v29  ;;  %156 = vst [vmem:[#allocation3] sm:$0x1f] %v154_v39  ;;  %157 = vst [vmem:[#allocation3 + $0x8] sm:$0x1f] %v155_v40  ;;  %v60_v46 = vmul.f32 %v223_v38, %v33_v5 }
   0xd   :  { %v61_v47 = vsel %vm36_vm1, %v57_v41, 0.0  ;;  %v62_v48 = vsel %vm36_vm1, %v58_v42, 0.0  ;;  %v310_v49 = vand.u32 2147483647, %v51_v36  ;;  %v312_v50 = vand.u32 2147483647, %v52_v37 }
   0xe   :  { %v63_v51 = vsel %vm36_vm1, %v59_v43, 0.0  ;;  %v316_v52 = vand.u32 2147483647, %v61_v47  ;;  %231 = vrsqrt.f32 %v302_v44  ;;  %v319_v53 = vand.u32 2147483647, %v62_v48 }
   0xf   :  { %233 = vrsqrt.f32 %v304_v45  ;;  %v64_v54 = vsel %vm36_vm1, %v60_v46, 0.0  ;;  %v325_v55 = vand.u32 2147483647, %v63_v51  ;;  %vm71_vm2 = vcmp.eq.f32.partialorder %v302_v44, inf  ;;  %v133_v46 = vld [vmem:[#allocation2] sm:$0x1f] }
  0x10   :  { %235 = vrsqrt.f32 %v310_v49  ;;  %v329_v58 = vand.u32 2147483647, %v64_v54  ;;  %vm73_vm3 = vcmp.eq.f32.partialorder %v302_v44, 0.0  ;;  %v74_v1 = vand.u32 2147483648, %v302_v44 }
  0x11   :  { %237 = vrsqrt.f32 %v312_v50  ;;  %vm78_vm4 = vcmp.eq.f32.partialorder %v304_v45, inf  ;;  %vm80_vm5 = vcmp.eq.f32.partialorder %v304_v45, 0.0  ;;  %v81_v2 = vand.u32 2147483648, %v304_v45 }
  0x12   :  { %239 = vrsqrt.f32 %v316_v52  ;;  %vm85_vm6 = vcmp.eq.f32.partialorder %v310_v49, inf  ;;  %vm87_vm7 = vcmp.eq.f32.partialorder %v310_v49, 0.0  ;;  %v88_v5 = vand.u32 2147483648, %v310_v49 }
  0x13   :  { %v193_v56 = vld [vmem:[#allocation3] sm:$0x1f]  ;;  %v194_v57 = vld [vmem:[#allocation3 + $0x8] sm:$0x1f]  ;;  %241 = vrsqrt.f32 %v319_v53  ;;  %vm92_vm8 = vcmp.eq.f32.partialorder %v312_v50, inf  ;;  %vm94_vm9 = vcmp.eq.f32.partialorder %v312_v50, 0.0 }
  0x14   :  { %v195_v59 = vsel %vm36_vm1, %v193_v56, 0.0  ;;  %v196_v60 = vsel %vm36_vm1, %v194_v57, 0.0  ;;  %243 = vrsqrt.f32 %v325_v55  ;;  %v95_v9 = vand.u32 2147483648, %v312_v50 }
  0x15   :  { %v197_v61 = vsel %vm135_vm0, %v195_v59, 0.0  ;;  %v198_v62 = vsel %vm135_vm0, %v196_v60, 0.0  ;;  %245 = vrsqrt.f32 %v329_v58  ;;  %vm103_vm10 = vcmp.eq.f32.partialorder %v316_v52, inf }
  0x16   :  { %v199_v63 = vadd.f32 %v198_v62, %v197_v61  ;;  %vm105_vm11 = vcmp.eq.f32.partialorder %v316_v52, 0.0  ;;  %v106_v16 = vand.u32 2147483648, %v316_v52  ;;  %vm110_vm12 = vcmp.eq.f32.partialorder %v319_v53, inf }
  0x17   :  { %vm112_vm13 = vcmp.eq.f32.partialorder %v319_v53, 0.0  ;;  %v113_v19 = vand.u32 2147483648, %v319_v53  ;;  %vm117_vm14 = vcmp.eq.f32.partialorder %v325_v55, inf  ;;  %vm119_vm15 = vcmp.eq.f32.partialorder %v325_v55, 0.0 }
  0x18   :  { %v232_v0 = vpop.eup %231  ;;  %200 = vadd.xlane.f32.xlu1 %v199_v63  ;;  %v120_v26 = vand.u32 2147483648, %v325_v55  ;;  %v127_v34 = vand.u32 2147483648, %v329_v58 }
  0x19   :  { %v234_v3 = vpop.eup %233  ;;  %v70_v4 = vmul.f32 %v232_v0, %v302_v44 }
  0x1a   :  { %v236_v7 = vpop.eup %235  ;;  %v77_v8 = vmul.f32 %v234_v3, %v304_v45 }
  0x1b   :  { %v238_v10 = vpop.eup %237  ;;  %v72_v11 = vsel %vm71_vm2, %v302_v44, %v70_v4  ;;  %v84_v12 = vmul.f32 %v236_v7, %v310_v49  ;;  %vm124_vm2 = vcmp.eq.f32.partialorder %v329_v58, inf }
  0x1c   :  { %v240_v13 = vpop.eup %239  ;;  %v79_v14 = vsel %vm78_vm4, %v304_v45, %v77_v8  ;;  %v91_v15 = vmul.f32 %v238_v10, %v312_v50  ;;  %v75_v20 = vsel %vm73_vm3, %v74_v1, %v72_v11  ;;  %vm126_vm3 = vcmp.eq.f32.partialorder %v329_v58, 0.0 }
  0x1d   :  { %v242_v17 = vpop.eup %241  ;;  %v102_v18 = vmul.f32 %v240_v13, %v316_v52  ;;  %v86_v21 = vsel %vm85_vm6, %v310_v49, %v84_v12  ;;  %v82_v24 = vsel %vm80_vm5, %v81_v2, %v79_v14  ;;  %vm176_vm4 = vcmp.ge.s32.totalorder %v275_v6, 1 }
  0x1e   :  { %v109_v22 = vmul.f32 %v242_v17, %v319_v53  ;;  %v244_v23 = vpop.eup %243  ;;  %v93_v27 = vsel %vm92_vm8, %v312_v50, %v91_v15  ;;  %v89_v32 = vsel %vm87_vm7, %v88_v5, %v86_v21  ;;  %v134_v50 = vld [vmem:[#allocation2 + $0x8] sm:$0x1f]  ;;  %vm177_vm5 = vcmp.lt.s32.totalorder %v275_v6, 5 }
  0x1f   :  { %v104_v25 = vsel %vm103_vm10, %v316_v52, %v102_v18  ;;  %v116_v30 = vmul.f32 %v244_v23, %v325_v55  ;;  %v246_v31 = vpop.eup %245  ;;  %v96_v39 = vsel %vm94_vm9, %v95_v9, %v93_v27  ;;  %vm178_vm6 = vmand %vm176_vm4, %vm177_vm5 }
  0x20   :  { %v107_v28 = vsel %vm105_vm11, %v106_v16, %v104_v25  ;;  %v111_v29 = vsel %vm110_vm12, %v319_v53, %v109_v22  ;;  %v123_v37 = vmul.f32 %v246_v31, %v329_v58 }
  0x21   :  { %v114_v33 = vsel %vm112_vm13, %v113_v19, %v111_v29  ;;  %v129_v35 = vadd.f32 %v107_v28, %v75_v20  ;;  %v118_v36 = vsel %vm117_vm14, %v325_v55, %v116_v30 }
  0x22   :  { %v130_v38 = vadd.f32 %v114_v33, %v82_v24  ;;  %v121_v40 = vsel %vm119_vm15, %v120_v26, %v118_v36  ;;  %v125_v41 = vsel %vm124_vm2, %v329_v58, %v123_v37 }
  0x23   :  { %v131_v42 = vadd.f32 %v121_v40, %v89_v32  ;;  %v136_v43 = vsel %vm135_vm0, %v129_v35, 0.0  ;;  %v128_v44 = vsel %vm126_vm3, %v127_v34, %v125_v41 }
  0x24   :  { %v132_v45 = vadd.f32 %v128_v44, %v96_v39  ;;  %v139_v48 = vsel %vm135_vm0, %v130_v38, 0.0 }
  0x25   :  { %v137_v47 = vsel %vm135_vm0, %v131_v42, 0.0 }
  0x26   :  { %v138_v49 = vadd.f32 %v137_v47, %v136_v43  ;;  %v140_v51 = vsel %vm135_vm0, %v132_v45, 0.0 }
  0x27   :  { %v141_v52 = vadd.f32 %v140_v51, %v139_v48 }
  0x28   :  { %v142_v53 = vadd.f32 %v138_v49, %v133_v46 }
  0x29   :  { %v143_v54 = vadd.f32 %v141_v52, %v134_v50 }
  0x2a   :  { %144 = vst [vmem:[#allocation2] sm:$0x1f] %v142_v53 }
  0x2b   :  { %145 = vst [vmem:[#allocation2 + $0x8] sm:$0x1f] %v143_v54 }
  0x31   :  { %v160_v55 = vld [vmem:[#allocation2] sm:$0x1f] }
  0x32   :  { %v162_v56 = vsel %vm36_vm1, %v160_v55, 0.0  ;;  %v179_v57 = vsel %vm178_vm6, %v160_v55, 0.0  ;;  %v161_v58 = vld [vmem:[#allocation2 + $0x8] sm:$0x1f] }
  0x33   :  { %v164_v59 = vsel %vm135_vm0, %v162_v56, 0.0  ;;  %v163_v60 = vsel %vm36_vm1, %v161_v58, 0.0  ;;  %v180_v61 = vsel %vm178_vm6, %v161_v58, 0.0  ;;  %v181_v63 = vsel %vm135_vm0, %v179_v57, 0.0 }
  0x34   :  { %v165_v62 = vsel %vm135_vm0, %v163_v60, 0.0  ;;  %v182_v0 = vsel %vm135_vm0, %v180_v61, 0.0 }
  0x35   :  { %v166_v1 = vadd.f32 %v165_v62, %v164_v59  ;;  %v183_v2 = vadd.f32 %v182_v0, %v181_v63 }
  0x37   :  { %167 = vadd.xlane.f32.xlu0 %v166_v1 }
  0x3b   :  { %184 = vadd.xlane.f32.xlu0 %v183_v2 }
  0xa5   :  { %v201_v3 = vpop.xlane.xlu1 %200 }
  0xa6   :  { %v202_v4 = vrot.slane %v201_v3, 4 }
  0xa8   :  { %v203_v5 = vadd.f32 %v202_v4, %v201_v3 }
  0xaa   :  { %v204_v10 = vrot.slane %v203_v5, 2 }
  0xac   :  { %v205_v15 = vadd.f32 %v204_v10, %v203_v5 }
  0xae   :  { %v206_v20 = vrot.slane %v205_v15, 1 }
  0xb0   :  { %v207_v23 = vadd.f32 %v206_v20, %v205_v15 }
  0xc4   :  { %v168_v7 = vpop.xlane.xlu0 %167 }
  0xc5   :  { %v169_v8 = vrot.slane %v168_v7, 4 }
  0xc7   :  { %v170_v9 = vadd.f32 %v169_v8, %v168_v7 }
  0xc8   :  { %v185_v6 = vpop.xlane.xlu0 %184 }
  0xc9   :  { %v171_v11 = vrot.slane %v170_v9, 2  ;;  %v186_v12 = vrot.slane %v185_v6, 4 }
  0xcb   :  { %v187_v13 = vadd.f32 %v186_v12, %v185_v6  ;;  %v172_v14 = vadd.f32 %v171_v11, %v170_v9 }
  0xcd   :  { %v188_v16 = vrot.slane %v187_v13, 2  ;;  %v173_v17 = vrot.slane %v172_v14, 1 }
  0xcf   :  { %v189_v18 = vadd.f32 %v188_v16, %v187_v13  ;;  %v174_v19 = vadd.f32 %v173_v17, %v172_v14 }
  0xd1   :  { %224 = vpush %v174_v19  ;;  %v190_v21 = vrot.slane %v189_v18, 1 }
  0xd3   :  { %v191_v22 = vadd.f32 %v190_v21, %v189_v18 }
  0xd5   :  { %226 = vpush %v191_v22 }
  0xd6   :  { %228 = vpush %v207_v23 }
 0x102   :  { %s225_s0 = spop %224 }
 0x103   :  { %s209_s27 = smul.f32 0.001953125, %s225_s0 }
 0x106   :  { %s227_s24 = spop %226 }
 0x107   :  { %s229_s25 = spop %228 }
 0x108   :  { %s210_s26 = smul.f32 0.001953125, %s229_s25 }
 0x10a   :  { %s211_s28 = smul.f32 %s227_s24, %s210_s26 }
 0x10c   :  { %s212_s29 = sadd.f32 %s211_s28, %s209_s27 }
 0x10e   :  { %v213_v24 = vstv %s212_s29 }
 0x10f   :  { %215 = vst [vmem:[%s429_s2] sm:$0xff] %v213_v24 }

</bundles_post_ra>
